<compile_context>
chip_gen: v7x
topology: tpu7x:2x2x1
jax: 0.10.0
libtpu: 0.0.40
codegen_flags: <defaults>
</compile_context>

<pallas_src>
import functools

import jax
import jax.numpy as jnp
from jax.experimental import pallas as pl
from jax.experimental.pallas import tpu as pltpu

# ---- hyperparameters implied by the PyTorch module ----
EMBED_DIM = 100
FILTER_SIZES = (3, 4, 5)
NUM_CLASSES = 4
NUM_FILTERS = 10
VOCAB_SIZE = 50          # small synthetic vocab (module builds it from data)
DROPOUT = 0.5            # identity at inference (PyTorch eval semantics)

# ---- lane-dense padded sizes used inside the kernel ----
FS_MAX = max(FILTER_SIZES)          # 5 shared taps (fs=3/4 taps are zero)
VPAD = 128                          # vocab 50 -> 128 (one-hot / folded-weight K)
CPAD = 128                          # fused conv channels 30 -> 128
COUT_PAD = 128                      # classes 4 -> 128 (lane-dense output)

assert VOCAB_SIZE <= VPAD


def _round_up(x, m):
    return (x + m - 1) // m * m


def cnn_kernel(ids_ref, w_ref, bc_ref, fcw_ref, fcb_ref, mask_ref, out_ref, *, cb):
    """One batch tile, processed in vreg-sized row chunks.

    ids_ref : (TB*L, FS_MAX) int32   ids_ref[b*L+t, k] = token at t+k (or -1)
    w_ref   : (FS_MAX, VPAD, CPAD) bf16  embedding-folded conv weights
    bc_ref  : (1, CPAD)     f32      fused conv bias (zero on padding channels)
    fcw_ref : (CPAD, COUT_PAD) f32   FC weight (padded)
    fcb_ref : (1, COUT_PAD) f32      FC bias (padded)
    mask_ref: (L, CPAD)     f32      1.0 where time position valid for channel
    out_ref : (TB, COUT_PAD) f32     logits (padded classes)
    """
    TB = out_ref.shape[0]
    L = mask_ref.shape[0]
    fs_max = w_ref.shape[0]
    VPAD_ = w_ref.shape[1]
    CPAD_ = w_ref.shape[2]
    rows = cb * L                     # rows per chunk (~128)
    n_chunks = TB // cb

    # Loop-invariant small operands (hoisted; JAX does not CSE broadcasts).
    bias = bc_ref[...]                # (1, CPAD)
    fcb = fcb_ref[...]                # (1, COUT_PAD)
    mask = mask_ref[...]              # (L, CPAD)
    viota = jax.lax.broadcasted_iota(jnp.int32, (rows, VPAD_), 1)

    def chunk(c):
        r0 = c * rows
        b0 = c * cb
        if not isinstance(c, int):
            if rows % 8 == 0:
                r0 = pl.multiple_of(r0, 8)
            if cb % 8 == 0:
                b0 = pl.multiple_of(b0, 8)

        ids = ids_ref[pl.ds(r0, rows), :]                     # (rows, FS_MAX) int32

        # Fused conv = sum over taps of (shifted one-hot) @ (folded weights).
        acc = jnp.zeros((rows, CPAD_), jnp.float32)
        for k in range(fs_max):                               # static, 5 taps
            onehot = (ids[:, k:k + 1] == viota).astype(jnp.bfloat16)  # exact 0/1
            acc = acc + jnp.dot(onehot, w_ref[k],
                                preferred_element_type=jnp.float32)

        act = jnp.maximum(acc + bias, 0.0)                    # bias + ReLU (f32)
        # Zero invalid time positions (exact because ReLU >= 0), then max-pool.
        act = act.reshape(cb, L, CPAD_) * mask                # (cb, L, CPAD)
        pooled = jnp.max(act, axis=1)                         # (cb, CPAD)

        # Dropout is identity in eval mode; final FC, direct lane-dense store.
        out_ref[pl.ds(b0, cb), :] = (
            jnp.dot(pooled, fcw_ref[...], preferred_element_type=jnp.float32)
            + fcb)

    if n_chunks == 1:
        chunk(0)
    else:
        def body(c, carry):
            chunk(c)
            return carry
        jax.lax.fori_loop(0, n_chunks, body, 0)


def pack_params(raw):
    """Fold the embedding into the conv weights and lane-pad for the kernel."""
    emb_table, convs, fc_w, fc_b = raw

    # W'_k[v, c] = sum_e emb[v, e] * conv_w[c, 0, k, e]  (fold done once, in f32)
    w_fold = jnp.zeros((FS_MAX, VPAD, CPAD), jnp.float32)
    b_slab = jnp.zeros((1, CPAD), jnp.float32)
    for g, (w, b) in enumerate(convs):            # w: (nf, 1, fs, E), b: (nf,)
        fs = w.shape[2]
        c0 = g * NUM_FILTERS
        for k in range(fs):
            folded = emb_table @ w[:, 0, k, :].T              # (V, nf)
            w_fold = w_fold.at[k, :VOCAB_SIZE, c0:c0 + NUM_FILTERS].set(folded)
        b_slab = b_slab.at[0, c0:c0 + NUM_FILTERS].set(b)

    fcw_pad = jnp.zeros((CPAD, COUT_PAD), jnp.float32)
    fcw_pad = fcw_pad.at[:len(FILTER_SIZES) * NUM_FILTERS, :NUM_CLASSES].set(fc_w.T)
    fcb_pad = jnp.zeros((1, COUT_PAD), jnp.float32).at[0, :NUM_CLASSES].set(fc_b)

    # bf16 operands for the big conv matmuls (f32 accumulate in-kernel); the
    # tiny FC matmul is kept f32 (<2% of MXU work, tighter parity).
    return w_fold.astype(jnp.bfloat16), b_slab, fcw_pad, fcb_pad


def _make_time_mask(L):
    """(L, CPAD) mask: 1.0 where time t is a valid conv output for the channel."""
    mask = jnp.zeros((L, CPAD), jnp.float32)
    t = jnp.arange(L)
    for g, fs in enumerate(FILTER_SIZES):
        c0 = g * NUM_FILTERS
        col = (t <= L - fs).astype(jnp.float32)[:, None]      # valid t: 0..L-fs
        mask = mask.at[:, c0:c0 + NUM_FILTERS].set(col)
    return mask


def _make_shifted_ids(x, B_pad, L):
    """(B_pad*L, FS_MAX) int32: [b*L+t, k] = x[b, t+k] if in range else -1 (OOV)."""
    B = x.shape[0]
    ids = jnp.full((B_pad, L), -1, jnp.int32).at[:B].set(x.astype(jnp.int32))
    taps = []
    for k in range(FS_MAX):
        col = jnp.full((B_pad, L), -1, jnp.int32)
        col = col.at[:, :L - k].set(ids[:, k:])
        taps.append(col)
    return jnp.stack(taps, axis=-1).reshape(B_pad * L, FS_MAX)


def cnn_forward(x, packed):
    """x: (B, L) int32 token ids. Returns (B, NUM_CLASSES) f32 logits."""
    w_fold, b_slab, fcw_pad, fcb_pad = packed
    B, L = x.shape
    # PyTorch's Conv2d would also fail for sequences shorter than the largest filter.
    assert L >= FS_MAX, "sequence length must be >= max(filter_sizes)"

    # Chunk size: keep (~128 rows, 128) intermediates inside the vreg file.
    cb = 1
    while cb * 2 <= 16 and cb * 2 * L <= 128:
        cb *= 2
    # Batch tile: up to 128 batch rows per grid step; when the batch allows,
    # keep >= 2 grid steps so the "parallel" axis shards across v7x's 2 TCs.
    ntiles = 2 if B > cb else 1
    TB = max(cb, min(128, _round_up((B + ntiles - 1) // ntiles, cb)))
    B_pad = _round_up(B, TB)
    if (TB * L) % 8 != 0 and TB != B_pad:     # keep BlockSpec (8,128)-legal
        TB = B_pad
    n_steps = B_pad // TB
    tbl = TB * L

    ids = _make_shifted_ids(x, B_pad, L)      # (B_pad*L, FS_MAX) int32 (tiny)
    mask = _make_time_mask(L)                 # (L, CPAD) f32

    cost = pl.CostEstimate(
        flops=(2 * FS_MAX * tbl * VPAD * CPAD + 2 * TB * CPAD * COUT_PAD) * n_steps,
        transcendentals=0,
        bytes_accessed=int(ids.size * 4 + w_fold.size * 2 + b_slab.size * 4
                           + fcw_pad.size * 4 + fcb_pad.size * 4 + mask.size * 4
                           + B_pad * COUT_PAD * 4))

    kernel = functools.partial(cnn_kernel, cb=cb)
    out = pl.pallas_call(
        kernel,
        out_shape=jax.ShapeDtypeStruct((B_pad, COUT_PAD), jnp.float32),
        grid_spec=pltpu.PrefetchScalarGridSpec(
            num_scalar_prefetch=0,
            grid=(n_steps,),
            in_specs=[
                pl.BlockSpec((tbl, FS_MAX), lambda i: (i, 0)),           # streamed ids
                pl.BlockSpec((FS_MAX, VPAD, CPAD), lambda i: (0, 0, 0)),  # resident weights
                pl.BlockSpec((1, CPAD), lambda i: (0, 0)),
                pl.BlockSpec((CPAD, COUT_PAD), lambda i: (0, 0)),
                pl.BlockSpec((1, COUT_PAD), lambda i: (0, 0)),
                pl.BlockSpec((L, CPAD), lambda i: (0, 0)),
            ],
            out_specs=pl.BlockSpec((TB, COUT_PAD), lambda i: (i, 0)),
        ),
        compiler_params=pltpu.CompilerParams(
            dimension_semantics=("parallel",)),
        cost_estimate=cost,
    )(ids, w_fold, b_slab, fcw_pad, fcb_pad, mask)
    return out[:B, :NUM_CLASSES]


def init_params(key):
    """Deterministic synthetic parameters with PyTorch-module shapes."""
    ks = jax.random.split(key, 9)
    emb_table = jax.random.normal(ks[0], (VOCAB_SIZE, EMBED_DIM), jnp.float32)
    convs = []
    for i, fs in enumerate(FILTER_SIZES):
        w = 0.1 * jax.random.normal(ks[1 + 2 * i],
                                    (NUM_FILTERS, 1, fs, EMBED_DIM), jnp.float32)
        b = 0.1 * jax.random.normal(ks[2 + 2 * i], (NUM_FILTERS,), jnp.float32)
        convs.append((w, b))
    in_feat = len(FILTER_SIZES) * NUM_FILTERS
    fc_w = 0.1 * jax.random.normal(ks[7], (NUM_CLASSES, in_feat), jnp.float32)
    fc_b = 0.1 * jax.random.normal(ks[8], (NUM_CLASSES,), jnp.float32)
    return emb_table, tuple(convs), fc_w, fc_b


def cnn_reference(x, raw):
    """Pure-JAX f32 reference with PyTorch eval semantics (correctness check)."""
    emb_table, convs, fc_w, fc_b = raw
    emb = emb_table[x].astype(jnp.float32)                         # (B, L, E)
    L = emb.shape[1]
    pooled = []
    for w, b in convs:                                             # w: (nf,1,fs,E)
        fs = w.shape[2]
        l_out = L - fs + 1
        conv = sum(jnp.einsum('ble,fe->blf', emb[:, k:k + l_out, :], w[:, 0, k, :])
                   for k in range(fs)) + b[None, None, :]
        pooled.append(jnp.max(jax.nn.relu(conv), axis=1))          # (B, nf)
    cat = jnp.concatenate(pooled, axis=-1)                         # (B, 3*nf)
    return cat @ fc_w.T + fc_b                                     # (B, C)


if __name__ == "__main__":
    key = jax.random.PRNGKey(0)
    pkey, xkey = jax.random.split(key)
    raw_params = init_params(pkey)
    packed_params = pack_params(raw_params)

    B, L = 2, 16
    x = jax.random.randint(xkey, (B, L), 0, VOCAB_SIZE, dtype=jnp.int32)

    out = jax.block_until_ready(cnn_forward(x, packed_params))
    ref = jax.block_until_ready(cnn_reference(x, raw_params))

    assert out.shape == (B, NUM_CLASSES), out.shape
    # bf16 rounding of the folded conv weights loosens exact-f32 parity slightly
    # (the one-hot operand is exact; accumulation is f32).
    err = float(jnp.max(jnp.abs(out - ref)))
    assert jnp.allclose(out, ref, atol=3e-2, rtol=3e-2), (err, out, ref)
    print("KERNEL_OK")
</pallas_src>

<mosaic_0001>
module attributes {stable_mosaic.version = 11 : i64} {
  func.func @cnn_kernel(%arg0: i32, %arg1: memref<128x5xi32, #tpu.memory_space<vmem>>, %arg2: memref<5x128x128xbf16, #tpu.memory_space<vmem>>, %arg3: memref<1x128xf32, #tpu.memory_space<vmem>>, %arg4: memref<128x128xf32, #tpu.memory_space<vmem>>, %arg5: memref<1x128xf32, #tpu.memory_space<vmem>>, %arg6: memref<16x128xf32, #tpu.memory_space<vmem>>, %arg7: memref<8x128xf32, #tpu.memory_space<vmem>>) attributes {dimension_semantics = [#tpu.dimension_semantics<parallel>], iteration_bounds = array<i64: 1>, scalar_prefetch = 0 : i64, scratch_operands = 0 : i64, tpu.core_type = #tpu.core_type<tc>, window_params = [{transform_indices = @transform_0, window_bounds = array<i64: 128, 5>}, {pipeline_mode = #tpu.pipeline_mode<synchronous>, transform_indices = @transform_1, window_bounds = array<i64: 5, 128, 128>}, {pipeline_mode = #tpu.pipeline_mode<synchronous>, transform_indices = @transform_2, window_bounds = array<i64: 1, 128>}, {pipeline_mode = #tpu.pipeline_mode<synchronous>, transform_indices = @transform_3, window_bounds = array<i64: 128, 128>}, {pipeline_mode = #tpu.pipeline_mode<synchronous>, transform_indices = @transform_4, window_bounds = array<i64: 1, 128>}, {pipeline_mode = #tpu.pipeline_mode<synchronous>, transform_indices = @transform_5, window_bounds = array<i64: 16, 128>}, {transform_indices = @transform_6, window_bounds = array<i64: 8, 128>}]} {
    %c0 = arith.constant 0 : index
    %c0_0 = arith.constant 0 : index
    %0 = vector.load %arg3[%c0, %c0_0] : memref<1x128xf32, #tpu.memory_space<vmem>>, vector<1x128xf32>
    %c0_1 = arith.constant 0 : index
    %c0_2 = arith.constant 0 : index
    %1 = vector.load %arg5[%c0_1, %c0_2] : memref<1x128xf32, #tpu.memory_space<vmem>>, vector<1x128xf32>
    %c0_3 = arith.constant 0 : index
    %c0_4 = arith.constant 0 : index
    %2 = vector.load %arg6[%c0_3, %c0_4] : memref<16x128xf32, #tpu.memory_space<vmem>>, vector<16x128xf32>
    %3 = tpu.iota {dimensions = array<i32: 1>} : vector<128x128xi32>
    %c0_5 = arith.constant 0 : index
    %c0_6 = arith.constant 0 : index
    %4 = vector.load %arg1[%c0_5, %c0_6] : memref<128x5xi32, #tpu.memory_space<vmem>>, vector<128x5xi32>
    %cst = arith.constant 0.000000e+00 : f32
    %5 = vector.broadcast %cst : f32 to vector<128x128xf32>
    %6 = vector.extract_strided_slice %4 {offsets = [0, 0], sizes = [128, 1], strides = [1, 1]} : vector<128x5xi32> to vector<128x1xi32>
    %7 = vector.broadcast %6 : vector<128x1xi32> to vector<128x128xi32>
    %8 = arith.cmpi eq, %7, %3 : vector<128x128xi32>
    %9 = arith.extui %8 : vector<128x128xi1> to vector<128x128xi32>
    %10 = arith.sitofp %9 : vector<128x128xi32> to vector<128x128xf32>
    %11 = arith.truncf %10 : vector<128x128xf32> to vector<128x128xbf16>
    %c0_7 = arith.constant 0 : index
    %c0_8 = arith.constant 0 : index
    %c0_9 = arith.constant 0 : index
    %12 = vector.load %arg2[%c0_7, %c0_8, %c0_9] : memref<5x128x128xbf16, #tpu.memory_space<vmem>>, vector<1x128x128xbf16>
    %13 = vector.shape_cast %12 : vector<1x128x128xbf16> to vector<128x128xbf16>
    %cst_10 = arith.constant dense<0.000000e+00> : vector<128x128xf32>
    %14 = tpu.matmul %11, %13, %cst_10 {dimension_numbers = #tpu.dot_dimension_numbers<[1], [0], [0], [1], [0, 0, 1, 1], [], []>} : vector<128x128xbf16>, vector<128x128xbf16>, vector<128x128xf32> -> vector<128x128xf32>
    %15 = arith.addf %5, %14 : vector<128x128xf32>
    %16 = vector.extract_strided_slice %4 {offsets = [0, 1], sizes = [128, 1], strides = [1, 1]} : vector<128x5xi32> to vector<128x1xi32>
    %17 = vector.broadcast %16 : vector<128x1xi32> to vector<128x128xi32>
    %18 = arith.cmpi eq, %17, %3 : vector<128x128xi32>
    %19 = arith.extui %18 : vector<128x128xi1> to vector<128x128xi32>
    %20 = arith.sitofp %19 : vector<128x128xi32> to vector<128x128xf32>
    %21 = arith.truncf %20 : vector<128x128xf32> to vector<128x128xbf16>
    %c1 = arith.constant 1 : index
    %c0_11 = arith.constant 0 : index
    %c0_12 = arith.constant 0 : index
    %22 = vector.load %arg2[%c1, %c0_11, %c0_12] : memref<5x128x128xbf16, #tpu.memory_space<vmem>>, vector<1x128x128xbf16>
    %23 = vector.shape_cast %22 : vector<1x128x128xbf16> to vector<128x128xbf16>
    %cst_13 = arith.constant dense<0.000000e+00> : vector<128x128xf32>
    %24 = tpu.matmul %21, %23, %cst_13 {dimension_numbers = #tpu.dot_dimension_numbers<[1], [0], [0], [1], [0, 0, 1, 1], [], []>} : vector<128x128xbf16>, vector<128x128xbf16>, vector<128x128xf32> -> vector<128x128xf32>
    %25 = arith.addf %15, %24 : vector<128x128xf32>
    %26 = vector.extract_strided_slice %4 {offsets = [0, 2], sizes = [128, 1], strides = [1, 1]} : vector<128x5xi32> to vector<128x1xi32>
    %27 = vector.broadcast %26 : vector<128x1xi32> to vector<128x128xi32>
    %28 = arith.cmpi eq, %27, %3 : vector<128x128xi32>
    %29 = arith.extui %28 : vector<128x128xi1> to vector<128x128xi32>
    %30 = arith.sitofp %29 : vector<128x128xi32> to vector<128x128xf32>
    %31 = arith.truncf %30 : vector<128x128xf32> to vector<128x128xbf16>
    %c2 = arith.constant 2 : index
    %c0_14 = arith.constant 0 : index
    %c0_15 = arith.constant 0 : index
    %32 = vector.load %arg2[%c2, %c0_14, %c0_15] : memref<5x128x128xbf16, #tpu.memory_space<vmem>>, vector<1x128x128xbf16>
    %33 = vector.shape_cast %32 : vector<1x128x128xbf16> to vector<128x128xbf16>
    %cst_16 = arith.constant dense<0.000000e+00> : vector<128x128xf32>
    %34 = tpu.matmul %31, %33, %cst_16 {dimension_numbers = #tpu.dot_dimension_numbers<[1], [0], [0], [1], [0, 0, 1, 1], [], []>} : vector<128x128xbf16>, vector<128x128xbf16>, vector<128x128xf32> -> vector<128x128xf32>
    %35 = arith.addf %25, %34 : vector<128x128xf32>
    %36 = vector.extract_strided_slice %4 {offsets = [0, 3], sizes = [128, 1], strides = [1, 1]} : vector<128x5xi32> to vector<128x1xi32>
    %37 = vector.broadcast %36 : vector<128x1xi32> to vector<128x128xi32>
    %38 = arith.cmpi eq, %37, %3 : vector<128x128xi32>
    %39 = arith.extui %38 : vector<128x128xi1> to vector<128x128xi32>
    %40 = arith.sitofp %39 : vector<128x128xi32> to vector<128x128xf32>
    %41 = arith.truncf %40 : vector<128x128xf32> to vector<128x128xbf16>
    %c3 = arith.constant 3 : index
    %c0_17 = arith.constant 0 : index
    %c0_18 = arith.constant 0 : index
    %42 = vector.load %arg2[%c3, %c0_17, %c0_18] : memref<5x128x128xbf16, #tpu.memory_space<vmem>>, vector<1x128x128xbf16>
    %43 = vector.shape_cast %42 : vector<1x128x128xbf16> to vector<128x128xbf16>
    %cst_19 = arith.constant dense<0.000000e+00> : vector<128x128xf32>
    %44 = tpu.matmul %41, %43, %cst_19 {dimension_numbers = #tpu.dot_dimension_numbers<[1], [0], [0], [1], [0, 0, 1, 1], [], []>} : vector<128x128xbf16>, vector<128x128xbf16>, vector<128x128xf32> -> vector<128x128xf32>
    %45 = arith.addf %35, %44 : vector<128x128xf32>
    %46 = vector.extract_strided_slice %4 {offsets = [0, 4], sizes = [128, 1], strides = [1, 1]} : vector<128x5xi32> to vector<128x1xi32>
    %47 = vector.broadcast %46 : vector<128x1xi32> to vector<128x128xi32>
    %48 = arith.cmpi eq, %47, %3 : vector<128x128xi32>
    %49 = arith.extui %48 : vector<128x128xi1> to vector<128x128xi32>
    %50 = arith.sitofp %49 : vector<128x128xi32> to vector<128x128xf32>
    %51 = arith.truncf %50 : vector<128x128xf32> to vector<128x128xbf16>
    %c4 = arith.constant 4 : index
    %c0_20 = arith.constant 0 : index
    %c0_21 = arith.constant 0 : index
    %52 = vector.load %arg2[%c4, %c0_20, %c0_21] : memref<5x128x128xbf16, #tpu.memory_space<vmem>>, vector<1x128x128xbf16>
    %53 = vector.shape_cast %52 : vector<1x128x128xbf16> to vector<128x128xbf16>
    %cst_22 = arith.constant dense<0.000000e+00> : vector<128x128xf32>
    %54 = tpu.matmul %51, %53, %cst_22 {dimension_numbers = #tpu.dot_dimension_numbers<[1], [0], [0], [1], [0, 0, 1, 1], [], []>} : vector<128x128xbf16>, vector<128x128xbf16>, vector<128x128xf32> -> vector<128x128xf32>
    %55 = arith.addf %45, %54 : vector<128x128xf32>
    %56 = vector.broadcast %0 : vector<1x128xf32> to vector<128x128xf32>
    %57 = arith.addf %55, %56 : vector<128x128xf32>
    %cst_23 = arith.constant 0.000000e+00 : f32
    %58 = vector.broadcast %cst_23 : f32 to vector<128x128xf32>
    %59 = arith.maximumf %57, %58 : vector<128x128xf32>
    %60 = vector.shape_cast %59 : vector<128x128xf32> to vector<8x16x128xf32>
    %61 = vector.shape_cast %2 : vector<16x128xf32> to vector<1x16x128xf32>
    %62 = vector.broadcast %61 : vector<1x16x128xf32> to vector<8x16x128xf32>
    %63 = arith.mulf %60, %62 : vector<8x16x128xf32>
    %cst_24 = arith.constant dense<0xFF800000> : vector<8x128xf32>
    %64 = vector.multi_reduction <maximumf>, %63, %cst_24 [1] : vector<8x16x128xf32> to vector<8x128xf32>
    %c0_25 = arith.constant 0 : index
    %c0_26 = arith.constant 0 : index
    %65 = vector.load %arg4[%c0_25, %c0_26] : memref<128x128xf32, #tpu.memory_space<vmem>>, vector<128x128xf32>
    %cst_27 = arith.constant dense<0.000000e+00> : vector<8x128xf32>
    %66 = tpu.matmul %64, %65, %cst_27 {dimension_numbers = #tpu.dot_dimension_numbers<[1], [0], [0], [1], [0, 0, 1, 1], [], []>} : vector<8x128xf32>, vector<128x128xf32>, vector<8x128xf32> -> vector<8x128xf32>
    %67 = vector.broadcast %1 : vector<1x128xf32> to vector<8x128xf32>
    %68 = arith.addf %66, %67 : vector<8x128xf32>
    %c0_28 = arith.constant 0 : index
    %c0_29 = arith.constant 0 : index
    %69 = vector.load %arg7[%c0_28, %c0_29] : memref<8x128xf32, #tpu.memory_space<vmem>>, vector<8x128xf32>
    tpu.vector_store %arg7[%c0_28, %c0_29], %68 {strides = array<i32>} : memref<8x128xf32, #tpu.memory_space<vmem>>, vector<8x128xf32>,
    return
  }
  func.func @transform_0(%arg0: i32) -> (i32, i32) {
    %c0_i32 = arith.constant 0 : i32
    %c0_i32_0 = arith.constant 0 : i32
    return %arg0, %c0_i32 : i32, i32
  }
  func.func @transform_1(%arg0: i32) -> (i32, i32, i32) {
    %c0_i32 = arith.constant 0 : i32
    %c0_i32_0 = arith.constant 0 : i32
    %c0_i32_1 = arith.constant 0 : i32
    %c0_i32_2 = arith.constant 0 : i32
    return %c0_i32, %c0_i32_0, %c0_i32_1 : i32, i32, i32
  }
  func.func @transform_2(%arg0: i32) -> (i32, i32) {
    %c0_i32 = arith.constant 0 : i32
    %c0_i32_0 = arith.constant 0 : i32
    %c0_i32_1 = arith.constant 0 : i32
    return %c0_i32, %c0_i32_0 : i32, i32
  }
  func.func @transform_3(%arg0: i32) -> (i32, i32) {
    %c0_i32 = arith.constant 0 : i32
    %c0_i32_0 = arith.constant 0 : i32
    %c0_i32_1 = arith.constant 0 : i32
    return %c0_i32, %c0_i32_0 : i32, i32
  }
  func.func @transform_4(%arg0: i32) -> (i32, i32) {
    %c0_i32 = arith.constant 0 : i32
    %c0_i32_0 = arith.constant 0 : i32
    %c0_i32_1 = arith.constant 0 : i32
    return %c0_i32, %c0_i32_0 : i32, i32
  }
  func.func @transform_5(%arg0: i32) -> (i32, i32) {
    %c0_i32 = arith.constant 0 : i32
    %c0_i32_0 = arith.constant 0 : i32
    %c0_i32_1 = arith.constant 0 : i32
    return %c0_i32, %c0_i32_0 : i32, i32
  }
  func.func @transform_6(%arg0: i32) -> (i32, i32) {
    %c0_i32 = arith.constant 0 : i32
    %c0_i32_0 = arith.constant 0 : i32
    return %arg0, %c0_i32 : i32, i32
  }
}

</mosaic_0001>

<bundles_post_ra>
// kernel: tpu_custom_call.1
= control target key start
LH: loop header
LB: loop body
LE: loop exit
PB: predicated region body
PF: predicated region fallthrough
CT: control target
= control target key end

     0   :  { %11 = vsyncpa [#allocation3], 0  ;;  %s2905_s0 = inlined_call_operand.vmem [shape: s32[128,5], index: 0, kind: input, shape index: {}]   ;;  %s2906_s1 = inlined_call_operand.hbm [shape: bf16[5,128,128], index: 1, kind: input, shape index: {}]   ;;  %s2907_s2 = inlined_call_operand.vmem [shape: f32[1,128], index: 2, kind: input, shape index: {}]   ;;  %s2908_s3 = inlined_call_operand.vmem [shape: f32[128,128], index: 3, kind: input, shape index: {}]   ;;  %s2909_s4 = inlined_call_operand.vmem [shape: f32[1,128], index: 4, kind: input, shape index: {}]   ;;  %s2910_s5 = inlined_call_operand.vmem [shape: f32[16,128], index: 5, kind: input, shape index: {}]   ;;  %s2911_s6 = inlined_call_operand.hbm [shape: f32[8,128], index: 6, kind: output, shape index: {}]  }
   0x1   :  { %12 = vsyncpa [#allocation4], 0  ;;  %s2400_s21 = smov [#allocation2]   ;;  %s2352_s25 = scalar_lea.hbm %s2906_s1, 5120 }
   0x2   :  { %s20_s22 = sshll.u32 %s2400_s21, 4  ;;  %p2353_p0 = scmp.ne.s32.totalorder %s2906_s1, %s2352_s25  ;;  %s21_s22 = int_to_ptr.vmem [resolvable:$true] %s20_s22 }
   0x3   :  { %p2356_p1 = scmp.lt.u32.totalorder %s2352_s25, %s2906_s1 }
   0x5   :  { %p2358_p2 = pnand %p2356_p1, %p2353_p0 }
   0x7   :  { %2361 = shalt.err (!%p2358_p2)
}
   0x8   :  { %s2362_s30 = scalar_lea.vmem %s21_s22, 5120  ;;  %p2367_p4 = scmp.lt.s32.totalorder %s21_s22, %s21_s22 }
   0x9   :  { %p2363_p3 = scmp.ne.s32.totalorder %s21_s22, %s2362_s30  ;;  %p2368_p5 = scmp.lt.s32.totalorder %s2362_s30, %s2362_s30 }
   0xb   :  { %p2369_p6 = por %p2368_p5, %p2367_p4 }
   0xd   :  { %p2370_p7 = pnand %p2369_p6, %p2363_p3 }
   0xf   :  { %2373 = shalt.err (!%p2370_p7)
}
  0x10   :  { %s2401_s7 = smov 64   ;;  %s2402_s8 = smov 4  }
  0x11   :  { %26 = dma.hbm_to_vmem [thread:$0]  %s2906_s1, 5120, %s21_s22, [#allocation3], %s2401_s7, %s2401_s7, %s2402_s8  }
  0x12   :  { %2396 = dma.done.wait [#allocation3], 5120  }
  0x13   :  { %2397 = vsyncadd [#allocation3], 4294962176  ;;  %v2403_v0 = vmov 2   ;;  %v2463_v1 = vld [vmem:[%s2905_s0 + $0x10] sm:$0xff]  ;;  %v2468_v2 = vld [vmem:[%s2905_s0] sm:$0xff]  ;;  %v2404_v29 = vmov 1   ;;  %v43_v39 = vlaneseq }
  0x14   :  { %2275 = vset.pattern.permute.xlu1 %v2403_v0  ;;  %2274 = vset.pattern.permute.xlu0 %v2403_v0  ;;  %v2475_v3 = vld [vmem:[%s2905_s0 + $0x18] sm:$0xff]  ;;  %v2480_v4 = vld [vmem:[%s2905_s0 + $0x8] sm:$0xff]  ;;  %v2492_v6 = vld [vmem:[%s2905_s0 + $0x20] sm:$0xff]  ;;  %v2405_v33 = vmov 3   ;;  %v2406_v36 = vmov 0   ;;  %v2407_v37 = vmov 4  }
  0x15   :  { %599 = vperm.xlu1 %2275, %v2463_v1   ;;  %593 = vperm.xlu0 %2274, %v2468_v2   ;;  %v2485_v5 = vld [vmem:[%s2905_s0 + $0x28] sm:$0xff]  ;;  %v2312_v7 = vld [vmem:[#allocation2 + $0x80] sm:$0xff]   ;;  %v2499_v9 = vld [vmem:[%s2905_s0 + $0x38] sm:$0xff]  ;;  %v2625_v42 = vand.u32 127, %v43_v39  ;;  %v2408_v45 = vmov 1.0|1.0  }
  0x16   :  { %v2313_v8 = vld [vmem:[#allocation2 + $0x88] sm:$0xff]   ;;  %2042 = vmatprep.subr.bf16.mxu0 %v2312_v7  ;;  %v2504_v10 = vld [vmem:[%s2905_s0 + $0x30] sm:$0xff]  ;;  %v2516_v13 = vld [vmem:[%s2905_s0 + $0x40] sm:$0xff]  ;;  %s2412_s27 = smov [#allocation5]  }
  0x17   :  { %2043 = vmatpush3.bf16.msra.mxu0 %v2312_v7  ;;  %v2314_v11 = vld [vmem:[#allocation2 + $0x90] sm:$0xff]   ;;  %v2509_v12 = vld [vmem:[%s2905_s0 + $0x48] sm:$0xff]  ;;  %v2315_v14 = vld [vmem:[#allocation2 + $0x98] sm:$0xff]   ;;  %s1670_s28 = sshll.u32 %s2412_s27, 4  ;;  %s1671_s28 = int_to_ptr.vmem [resolvable:$true] %s1670_s28 }
  0x18   :  { %2044 = vmatprep.subr.bf16.mxu0 %v2313_v8  ;;  %v2521_v15 = vld [vmem:[%s2905_s0 + $0x58] sm:$0xff]  ;;  %v2526_v16 = vld [vmem:[%s2905_s0 + $0x50] sm:$0xff]  ;;  %v2316_v17 = vld [vmem:[#allocation2 + $0xa0] sm:$0xff]   ;;  %s2374_s29 = scalar_lea.vmem %s1671_s28, 128  ;;  %p2379_p9 = scmp.lt.s32.totalorder %s1671_s28, %s1671_s28 }
  0x19   :  { %602 = vperm.xlu1 %2275, %v2475_v3   ;;  %596 = vperm.xlu0 %2274, %v2480_v4   ;;  %v2320_v18 = vld [vmem:[#allocation2 + $0x40] sm:$0xff]   ;;  %v2533_v19 = vld [vmem:[%s2905_s0 + $0x68] sm:$0xff]  ;;  %v2545_v23 = vld [vmem:[%s2905_s0 + $0x78] sm:$0xff]  ;;  %p2375_p8 = scmp.ne.s32.totalorder %s1671_s28, %s2374_s29  ;;  %p2380_p10 = scmp.lt.s32.totalorder %s2374_s29, %s2374_s29 }
  0x1a   :  { %1978 = vmatprep.subr.bf16.mxu1 %v2320_v18  ;;  %v2538_v20 = vld [vmem:[%s2905_s0 + $0x60] sm:$0xff]  ;;  %v2317_v21 = vld [vmem:[#allocation2 + $0xa8] sm:$0xff]   ;;  %v2550_v24 = vld [vmem:[%s2905_s0 + $0x70] sm:$0xff] }
  0x1b   :  { %2045 = vmatpush3.bf16.msra.mxu0 %v2313_v8  ;;  %1979 = vmatpush3.bf16.msra.mxu1 %v2320_v18  ;;  %v2321_v22 = vld [vmem:[#allocation2 + $0x48] sm:$0xff]   ;;  %v2318_v25 = vld [vmem:[#allocation2 + $0xb0] sm:$0xff]   ;;  %v2325_v27 = vld [vmem:[#allocation2 + $0x58] sm:$0xff]   ;;  %p2381_p11 = por %p2380_p10, %p2379_p9 }
  0x1c   :  { %2046 = vmatprep.subr.bf16.mxu0 %v2314_v11  ;;  %1980 = vmatprep.subr.bf16.mxu1 %v2321_v22  ;;  %v2323_v26 = vld [vmem:[#allocation2 + $0x50] sm:$0xff]   ;;  %v2319_v28 = vld [vmem:[#allocation2 + $0xb8] sm:$0xff]   ;;  %v2327_v30 = vld [vmem:[#allocation2 + $0x60] sm:$0xff]  }
  0x1d   :  { %608 = vperm.xlu1 %2275, %v2485_v5   ;;  %605 = vperm.xlu0 %2274, %v2492_v6   ;;  %v2560_v31 = vld [vmem:[#allocation2 + $0xc0] sm:$0xff]   ;;  %v2329_v32 = vld [vmem:[#allocation2 + $0x68] sm:$0xff]   ;;  %v2331_v34 = vld [vmem:[#allocation2 + $0x70] sm:$0xff]   ;;  %p2382_p12 = pnand %p2381_p11, %p2375_p8 }
  0x1e   :  { %v2333_v35 = vld [vmem:[#allocation2 + $0x78] sm:$0xff]   ;;  %v2614_v38 = vld [vmem:[#allocation2] sm:$0xff]   ;;  %v2324_v48 = vld [vmem:[#allocation2 + $0xc8] sm:$0xff]  }
  0x1f   :  { %2047 = vmatpush3.bf16.msra.mxu0 %v2314_v11  ;;  %1981 = vmatpush3.bf16.msra.mxu1 %v2321_v22  ;;  %v2326_v49 = vld [vmem:[#allocation2 + $0xd0] sm:$0xff]   ;;  %v2328_v52 = vld [vmem:[#allocation2 + $0xd8] sm:$0xff]   ;;  %v2330_v55 = vld [vmem:[#allocation2 + $0xe0] sm:$0xff]  }
  0x20   :  { %2048 = vmatprep.subr.bf16.mxu0 %v2315_v14  ;;  %1982 = vmatprep.subr.bf16.mxu1 %v2323_v26  ;;  %v2332_v58 = vld [vmem:[#allocation2 + $0xe8] sm:$0xff]   ;;  %v2334_v61 = vld [vmem:[#allocation2 + $0xf0] sm:$0xff]   ;;  %v2335_v0 = vld [vmem:[#allocation2 + $0xf8] sm:$0xff]  }
  0x21   :  { %614 = vperm.xlu1 %2275, %v2499_v9   ;;  %611 = vperm.xlu0 %2274, %v2504_v10   ;;  %v2341_v22 = vld [vmem:[#allocation2 + $0x18] sm:$0xff]  }
  0x23   :  { %2049 = vmatpush3.bf16.msra.mxu0 %v2315_v14  ;;  %1983 = vmatpush3.bf16.msra.mxu1 %v2323_v26  ;;  %v2342_v26 = vld [vmem:[#allocation2 + $0x110] sm:$0xff]  }
  0x24   :  { %2050 = vmatprep.subr.bf16.mxu0 %v2316_v17  ;;  %1984 = vmatprep.subr.bf16.mxu1 %v2325_v27 }
  0x25   :  { %620 = vperm.xlu1 %2275, %v2509_v12   ;;  %617 = vperm.xlu0 %2274, %v2516_v13  }
  0x27   :  { %2051 = vmatpush3.bf16.msra.mxu0 %v2316_v17  ;;  %1985 = vmatpush3.bf16.msra.mxu1 %v2325_v27  ;;  %v2339_v17 = vld [vmem:[#allocation2 + $0x10] sm:$0xff]  }
  0x28   :  { %2052 = vmatprep.subr.bf16.mxu0 %v2317_v21  ;;  %1986 = vmatprep.subr.bf16.mxu1 %v2327_v30 }
  0x29   :  { %626 = vperm.xlu1 %2275, %v2521_v15   ;;  %623 = vperm.xlu0 %2274, %v2526_v16  }
  0x2b   :  { %2053 = vmatpush3.bf16.msra.mxu0 %v2317_v21  ;;  %1987 = vmatpush3.bf16.msra.mxu1 %v2327_v30  ;;  %v2340_v21 = vld [vmem:[#allocation2 + $0x108] sm:$0xff]   ;;  %v2346_v30 = vld [vmem:[#allocation2 + $0x120] sm:$0xff]  }
  0x2c   :  { %2054 = vmatprep.subr.bf16.mxu0 %v2318_v25  ;;  %1988 = vmatprep.subr.bf16.mxu1 %v2329_v32 }
  0x2d   :  { %632 = vperm.xlu1 %2275, %v2533_v19   ;;  %629 = vperm.xlu0 %2274, %v2538_v20  }
  0x2f   :  { %2055 = vmatpush3.bf16.msra.mxu0 %v2318_v25  ;;  %1989 = vmatpush3.bf16.msra.mxu1 %v2329_v32 }
  0x30   :  { %2056 = vmatprep.subr.bf16.mxu0 %v2319_v28  ;;  %1990 = vmatprep.subr.bf16.mxu1 %v2331_v34 }
  0x31   :  { %638 = vperm.xlu1 %2275, %v2545_v23   ;;  %635 = vperm.xlu0 %2274, %v2550_v24  }
  0x33   :  { %2057 = vmatpush3.bf16.msra.mxu0 %v2319_v28  ;;  %1991 = vmatpush3.bf16.msra.mxu1 %v2331_v34  ;;  %v2344_v28 = vld [vmem:[#allocation2 + $0x118] sm:$0xff]   ;;  %v2348_v34 = vld [vmem:[#allocation2 + $0x128] sm:$0xff]  }
  0x34   :  { %2074 = vmatprep.subr.bf16.mxu0 %v2560_v31  ;;  %1992 = vmatprep.subr.bf16.mxu1 %v2333_v35 }
  0x35   :  { %2277 = vset.pattern.permute.xlu1 %v2404_v29  ;;  %2276 = vset.pattern.permute.xlu0 %v2404_v29 }
  0x36   :  { %185 = vperm.xlu1 %2277, %v2480_v4   ;;  %182 = vperm.xlu0 %2276, %v2468_v2  }
  0x37   :  { %1993 = vmatpush3.bf16.msra.mxu1 %v2333_v35  ;;  %v2349_v35 = vld [vmem:[#allocation2 + $0x38] sm:$0xff]  }
  0x38   :  { %2010 = vmatprep.subr.bf16.mxu1 %v2614_v38 }
  0x3a   :  { %2278 = vset.pattern.permute.xlu1 %v2405_v33  ;;  %194 = vperm.xlu0 %2276, %v2492_v6  }
  0x3b   :  { %875 = vperm.xlu1 %2278, %v2468_v2  }
  0x3e   :  { %206 = vperm.xlu0 %2276, %v2516_v13  }
  0x3f   :  { %2279 = vset.pattern.permute.xlu1 %v2404_v29 }
  0x40   :  { %188 = vperm.xlu1 %2279, %v2463_v1  }
  0x42   :  { %218 = vperm.xlu0 %2276, %v2538_v20  }
  0x44   :  { %191 = vperm.xlu1 %2279, %v2475_v3  }
  0x46   :  { %2289 = vset.pattern.permute.xlu0 %v2405_v33 }
  0x47   :  { %878 = vperm.xlu0 %2289, %v2480_v4  }
  0x48   :  { %2280 = vset.pattern.permute.xlu1 %v2405_v33 }
  0x49   :  { %884 = vperm.xlu1 %2280, %v2475_v3  }
  0x4b   :  { %881 = vperm.xlu0 %2289, %v2463_v1  }
  0x4d   :  { %2281 = vset.pattern.permute.xlu1 %v2404_v29 }
  0x4e   :  { %197 = vperm.xlu1 %2281, %v2485_v5  }
  0x4f   :  { %890 = vperm.xlu0 %2289, %v2485_v5  }
  0x52   :  { %2282 = vset.pattern.permute.xlu1 %v2405_v33 }
  0x53   :  { %887 = vperm.xlu1 %2282, %v2492_v6   ;;  %893 = vperm.xlu0 %2289, %v2504_v10  }
  0x57   :  { %2283 = vset.pattern.permute.xlu1 %v2404_v29  ;;  %902 = vperm.xlu0 %2289, %v2509_v12  }
  0x58   :  { %200 = vperm.xlu1 %2283, %v2504_v10  }
  0x5b   :  { %905 = vperm.xlu0 %2289, %v2526_v16  }
  0x5c   :  { %203 = vperm.xlu1 %2283, %v2499_v9  }
  0x5f   :  { %914 = vperm.xlu0 %2289, %v2533_v19  }
  0x60   :  { %2284 = vset.pattern.permute.xlu1 %v2405_v33 }
  0x61   :  { %896 = vperm.xlu1 %2284, %v2499_v9  }
  0x63   :  { %917 = vperm.xlu0 %2289, %v2550_v24  }
  0x65   :  { %2285 = vset.pattern.permute.xlu1 %v2404_v29 }
  0x66   :  { %209 = vperm.xlu1 %2285, %v2509_v12  }
  0x67   :  { %2294 = vset.pattern.permute.xlu0 %v2406_v36 }
  0x68   :  { %62 = vperm.xlu0 %2294, %v2468_v2  }
  0x6a   :  { %2286 = vset.pattern.permute.xlu1 %v2405_v33 }
  0x6b   :  { %899 = vperm.xlu1 %2286, %v2516_v13  }
  0x6c   :  { %74 = vperm.xlu0 %2294, %v2492_v6  }
  0x6f   :  { %2287 = vset.pattern.permute.xlu1 %v2404_v29 }
  0x70   :  { %212 = vperm.xlu1 %2287, %v2526_v16   ;;  %86 = vperm.xlu0 %2294, %v2516_v13  }
  0x74   :  { %215 = vperm.xlu1 %2287, %v2521_v15   ;;  %98 = vperm.xlu0 %2294, %v2538_v20  }
  0x78   :  { %2288 = vset.pattern.permute.xlu1 %v2405_v33  ;;  %2307 = vset.pattern.permute.xlu0 %v2407_v37 }
  0x79   :  { %908 = vperm.xlu1 %2288, %v2521_v15   ;;  %1160 = vperm.xlu0 %2307, %v2480_v4  }
  0x7d   :  { %2290 = vset.pattern.permute.xlu1 %v2404_v29  ;;  %1163 = vperm.xlu0 %2307, %v2463_v1  }
  0x7e   :  { %221 = vperm.xlu1 %2290, %v2533_v19  }
  0x81   :  { %1172 = vperm.xlu0 %2307, %v2485_v5  }
  0x82   :  { %2291 = vset.pattern.permute.xlu1 %v2405_v33 }
  0x83   :  { %911 = vperm.xlu1 %2291, %v2538_v20  }
  0x85   :  { %1175 = vperm.xlu0 %2307, %v2504_v10  }
  0x87   :  { %2292 = vset.pattern.permute.xlu1 %v2404_v29  ;;  %v2345_v29 = vld [vmem:[#allocation2 + $0x28] sm:$0xff]  }
  0x88   :  { %224 = vperm.xlu1 %2292, %v2550_v24  }
  0x89   :  { %1184 = vperm.xlu0 %2307, %v2509_v12  }
  0x8c   :  { %227 = vperm.xlu1 %2292, %v2545_v23  }
  0x8d   :  { %1187 = vperm.xlu0 %2307, %v2526_v16  }
  0x90   :  { %2293 = vset.pattern.permute.xlu1 %v2405_v33 }
  0x91   :  { %920 = vperm.xlu1 %2293, %v2545_v23   ;;  %1196 = vperm.xlu0 %2307, %v2533_v19  }
  0x94   :  { %v600_v40 = vpop.permute.xlu1 %599  ;;  %v594_v41 = vpop.permute.xlu0 %593 }
  0x95   :  { %2295 = vset.pattern.permute.xlu1 %v2406_v36  ;;  %1199 = vperm.xlu0 %2307, %v2550_v24   ;;  %vm640_vm0 = vcmp.eq.s32.totalorder %v594_v41, %v2625_v42  ;;  %vm642_vm1 = vcmp.eq.s32.totalorder %v600_v40, %v2625_v42  ;;  %v2351_v40 = vld [vmem:[#allocation2 + $0x138] sm:$0xff]  }
  0x96   :  { %65 = vperm.xlu1 %2295, %v2480_v4  }
  0x98   :  { %v603_v43 = vpop.permute.xlu1 %602  ;;  %v597_v44 = vpop.permute.xlu0 %596 }
  0x99   :  { %vm643_vm2 = vcmp.eq.s32.totalorder %v603_v43, %v2625_v42  ;;  %vm641_vm3 = vcmp.eq.s32.totalorder %v597_v44, %v2625_v42 }
  0x9a   :  { %vm1785_vm4 = vmpackc.low %vm643_vm2, %vm642_vm1  ;;  %2296 = vset.pattern.permute.xlu1 %v2407_v37 }
  0x9b   :  { %1157 = vperm.xlu1 %2296, %v2468_v2   ;;  %vm1783_vm5 = vmpackc.low %vm641_vm3, %vm640_vm0 }
  0x9c   :  { %2058 = vmatprep.mubr.msk.bf16.mxu0 %vm1783_vm5, %v2408_v45  ;;  %v609_v46 = vpop.permute.xlu1 %608  ;;  %v606_v47 = vpop.permute.xlu0 %605 }
  0x9d   :  { %vm645_vm6 = vcmp.eq.s32.totalorder %v609_v46, %v2625_v42  ;;  %2059 = vmatmul.mubr.msk.bf16.vlgmr.msra.gmra.mrb[0].mxu0 %vm1785_vm4, %v2408_v45  ;;  %vm644_vm7 = vcmp.eq.s32.totalorder %v606_v47, %v2625_v42 }
  0x9e   :  { %vm1787_vm8 = vmpackc.low %vm645_vm6, %vm644_vm7  ;;  %2075 = vmatpush3.bf16.msra.mxu0 %v2560_v31  ;;  %v2347_v31 = vld [vmem:[#allocation2 + $0x30] sm:$0xff]  }
  0x9f   :  { %2297 = vset.pattern.permute.xlu1 %v2406_v36  ;;  %2062 = vmatprep.mubr.msk.bf16.mxu0 %vm1787_vm8, %v2408_v45 }
  0xa0   :  { %v615_v50 = vpop.permute.xlu1 %614  ;;  %68 = vperm.xlu1 %2297, %v2463_v1   ;;  %v612_v51 = vpop.permute.xlu0 %611  ;;  %2076 = vmatprep.subr.bf16.mxu0 %v2324_v48 }
  0xa1   :  { %vm647_vm9 = vcmp.eq.s32.totalorder %v615_v50, %v2625_v42  ;;  %vm646_vm10 = vcmp.eq.s32.totalorder %v612_v51, %v2625_v42 }
  0xa2   :  { %vm1789_vm11 = vmpackc.low %vm647_vm9, %vm646_vm10  ;;  %2077 = vmatpush3.bf16.msra.mxu0 %v2324_v48 }
  0xa3   :  { %2078 = vmatprep.subr.bf16.mxu0 %v2326_v49 }
  0xa4   :  { %v621_v53 = vpop.permute.xlu1 %620  ;;  %71 = vperm.xlu1 %2297, %v2475_v3   ;;  %v618_v54 = vpop.permute.xlu0 %617 }
  0xa5   :  { %vm649_vm12 = vcmp.eq.s32.totalorder %v621_v53, %v2625_v42  ;;  %2063 = vmatmul.mubr.msk.bf16.gmra.mrb[4].mxu0 %vm1789_vm11, %v2408_v45  ;;  %vm648_vm13 = vcmp.eq.s32.totalorder %v618_v54, %v2625_v42 }
  0xa6   :  { %vm1791_vm14 = vmpackc.low %vm649_vm12, %vm648_vm13  ;;  %2079 = vmatpush3.bf16.msra.mxu0 %v2326_v49 }
  0xa7   :  { %2066 = vmatprep.mubr.msk.bf16.mxu0 %vm1791_vm14, %v2408_v45  ;;  %2080 = vmatprep.subr.bf16.mxu0 %v2328_v52 }
  0xa8   :  { %v627_v56 = vpop.permute.xlu1 %626  ;;  %2298 = vset.pattern.permute.xlu1 %v2407_v37  ;;  %v624_v57 = vpop.permute.xlu0 %623 }
  0xa9   :  { %vm651_vm15 = vcmp.eq.s32.totalorder %v627_v56, %v2625_v42  ;;  %vm650_vm0 = vcmp.eq.s32.totalorder %v624_v57, %v2625_v42  ;;  %1166 = vperm.xlu1 %2298, %v2475_v3   ;;  %v2338_v3 = vld [vmem:[#allocation2 + $0x100] sm:$0xff]  }
  0xaa   :  { %vm1793_vm1 = vmpackc.low %vm651_vm15, %vm650_vm0  ;;  %2081 = vmatpush3.bf16.msra.mxu0 %v2328_v52 }
  0xab   :  { %2082 = vmatprep.subr.bf16.mxu0 %v2330_v55 }
  0xac   :  { %v633_v59 = vpop.permute.xlu1 %632  ;;  %v630_v60 = vpop.permute.xlu0 %629 }
  0xad   :  { %vm653_vm2 = vcmp.eq.s32.totalorder %v633_v59, %v2625_v42  ;;  %2067 = vmatmul.mubr.msk.bf16.gmra.mrb[8].mxu0 %vm1793_vm1, %v2408_v45  ;;  %vm652_vm3 = vcmp.eq.s32.totalorder %v630_v60, %v2625_v42  ;;  %2299 = vset.pattern.permute.xlu1 %v2406_v36 }
  0xae   :  { %vm1795_vm4 = vmpackc.low %vm653_vm2, %vm652_vm3  ;;  %77 = vperm.xlu1 %2299, %v2485_v5   ;;  %2083 = vmatpush3.bf16.msra.mxu0 %v2330_v55 }
  0xaf   :  { %2070 = vmatprep.mubr.msk.bf16.mxu0 %vm1795_vm4, %v2408_v45  ;;  %2084 = vmatprep.subr.bf16.mxu0 %v2332_v58 }
  0xb0   :  { %v639_v62 = vpop.permute.xlu1 %638  ;;  %v636_v63 = vpop.permute.xlu0 %635 }
  0xb1   :  { %vm655_vm5 = vcmp.eq.s32.totalorder %v639_v62, %v2625_v42  ;;  %vm654_vm6 = vcmp.eq.s32.totalorder %v636_v63, %v2625_v42 }
  0xb2   :  { %vm1797_vm7 = vmpackc.low %vm655_vm5, %vm654_vm6  ;;  %2300 = vset.pattern.permute.xlu1 %v2407_v37  ;;  %2085 = vmatpush3.bf16.msra.mxu0 %v2332_v58 }
  0xb3   :  { %1169 = vperm.xlu1 %2300, %v2492_v6   ;;  %2086 = vmatprep.subr.bf16.mxu0 %v2334_v61 }
  0xb5   :  { %2071 = vmatmul.mubr.msk.bf16.gmra.mrb[12].mxu0 %vm1797_vm7, %v2408_v45  ;;  %v186_v1 = vpop.permute.xlu1 %185  ;;  %v183_v2 = vpop.permute.xlu0 %182 }
  0xb6   :  { %vm230_vm8 = vcmp.eq.s32.totalorder %v186_v1, %v2625_v42  ;;  %vm229_vm9 = vcmp.eq.s32.totalorder %v183_v2, %v2625_v42  ;;  %2087 = vmatpush3.bf16.msra.mxu0 %v2334_v61 }
  0xb7   :  { %2301 = vset.pattern.permute.xlu1 %v2406_v36  ;;  %vm1719_vm10 = vmpackc.low %vm230_vm8, %vm229_vm9  ;;  %2088 = vmatprep.subr.bf16.mxu0 %v2335_v0 }
  0xb8   :  { %80 = vperm.xlu1 %2301, %v2504_v10   ;;  %1994 = vmatprep.mubr.msk.bf16.mxu1 %vm1719_vm10, %v2408_v45  ;;  %v2337_v10 = vld [vmem:[#allocation2 + $0x8] sm:$0xff]  }
  0xb9   :  { %v195_v4 = vpop.permute.xlu0 %194 }
  0xba   :  { %v876_v5 = vpop.permute.xlu1 %875  ;;  %2089 = vmatpush3.bf16.msra.mxu0 %v2335_v0  ;;  %vm233_vm3 = vcmp.eq.s32.totalorder %v195_v4, %v2625_v42 }
  0xbb   :  { %2106 = vmatprep.subr.bf16.mxu0 %v2338_v3  ;;  %vm922_vm14 = vcmp.eq.s32.totalorder %v876_v5, %v2625_v42 }
  0xbc   :  { %83 = vperm.xlu1 %2301, %v2499_v9  }
  0xbd   :  { %v2672_v6 = vpop.permute.xlu0 %206 }
  0xbf   :  { %v189_v7 = vpop.permute.xlu1 %188 }
  0xc0   :  { %2302 = vset.pattern.permute.xlu1 %v2407_v37  ;;  %vm231_vm11 = vcmp.eq.s32.totalorder %v189_v7, %v2625_v42 }
  0xc1   :  { %1178 = vperm.xlu1 %2302, %v2499_v9   ;;  %v2676_v8 = vpop.permute.xlu0 %218 }
  0xc3   :  { %v192_v11 = vpop.permute.xlu1 %191 }
  0xc4   :  { %vm232_vm12 = vcmp.eq.s32.totalorder %v192_v11, %v2625_v42 }
  0xc5   :  { %vm1721_vm13 = vmpackc.low %vm232_vm12, %vm231_vm11  ;;  %2303 = vset.pattern.permute.xlu1 %v2406_v36 }
  0xc6   :  { %89 = vperm.xlu1 %2303, %v2509_v12   ;;  %1995 = vmatmul.mubr.msk.bf16.vlgmr.msra.gmra.mrb[0].mxu1 %vm1721_vm13, %v2408_v45  ;;  %v879_v14 = vpop.permute.xlu0 %878 }
  0xc7   :  { %vm923_vm15 = vcmp.eq.s32.totalorder %v879_v14, %v2625_v42  ;;  %2011 = vmatpush3.bf16.msra.mxu1 %v2614_v38  ;;  %v2350_v38 = vld [vmem:[#allocation2 + $0x130] sm:$0xff]  }
  0xc8   :  { %vm1823_vm0 = vmpackc.low %vm923_vm15, %vm922_vm14  ;;  %v885_v9 = vpop.permute.xlu1 %884  ;;  %2012 = vmatprep.subr.bf16.mxu1 %v2337_v10 }
  0xc9   :  { %2090 = vmatprep.mubr.msk.bf16.mxu0 %vm1823_vm0, %v2408_v45  ;;  %vm925_vm1 = vcmp.eq.s32.totalorder %v885_v9, %v2625_v42  ;;  %vm237_vm0 = vcmp.eq.s32.totalorder %v2672_v6, %v2625_v42 }
  0xca   :  { %2304 = vset.pattern.permute.xlu1 %v2407_v37  ;;  %v882_v18 = vpop.permute.xlu0 %881 }
  0xcb   :  { %vm924_vm2 = vcmp.eq.s32.totalorder %v882_v18, %v2625_v42  ;;  %1181 = vperm.xlu1 %2304, %v2516_v13   ;;  %2013 = vmatpush3.bf16.msra.mxu1 %v2337_v10  ;;  %v2343_v13 = vld [vmem:[#allocation2 + $0x20] sm:$0xff]  }
  0xcc   :  { %vm1825_vm4 = vmpackc.low %vm925_vm1, %vm924_vm2  ;;  %2014 = vmatprep.subr.bf16.mxu1 %v2339_v17 }
  0xcd   :  { %v198_v12 = vpop.permute.xlu1 %197  ;;  %2091 = vmatmul.mubr.msk.bf16.vlgmr.msra.gmra.mrb[0].mxu0 %vm1825_vm4, %v2408_v45 }
  0xce   :  { %vm234_vm5 = vcmp.eq.s32.totalorder %v198_v12, %v2625_v42  ;;  %v891_v25 = vpop.permute.xlu0 %890  ;;  %2107 = vmatpush3.bf16.msra.mxu0 %v2338_v3 }
  0xcf   :  { %vm1723_vm6 = vmpackc.low %vm234_vm5, %vm233_vm3  ;;  %2305 = vset.pattern.permute.xlu1 %v2406_v36  ;;  %2015 = vmatpush3.bf16.msra.mxu1 %v2339_v17  ;;  %vm927_vm7 = vcmp.eq.s32.totalorder %v891_v25, %v2625_v42  ;;  %v1548_v25 = vld [vmem:[%s2908_s3] sm:$0xff] }
  0xd0   :  { %92 = vperm.xlu1 %2305, %v2526_v16   ;;  %1998 = vmatprep.mubr.msk.bf16.mxu1 %vm1723_vm6, %v2408_v45 }
  0xd1   :  { %2108 = vmatprep.subr.bf16.mxu0 %v2340_v21  ;;  %2016 = vmatprep.subr.bf16.mxu1 %v2341_v22 }
  0xd2   :  { %v888_v27 = vpop.permute.xlu1 %887  ;;  %2109 = vmatpush3.bf16.msra.mxu0 %v2340_v21  ;;  %v894_v33 = vpop.permute.xlu0 %893 }
  0xd3   :  { %vm926_vm8 = vcmp.eq.s32.totalorder %v888_v27, %v2625_v42  ;;  %2017 = vmatpush3.bf16.msra.mxu1 %v2341_v22  ;;  %2110 = vmatprep.subr.bf16.mxu0 %v2342_v26  ;;  %vm928_vm13 = vcmp.eq.s32.totalorder %v894_v33, %v2625_v42  ;;  %v2409_v27 = vmov 0.0|0.0  }
  0xd4   :  { %vm1827_vm9 = vmpackc.low %vm927_vm7, %vm926_vm8  ;;  %95 = vperm.xlu1 %2305, %v2521_v15   ;;  %2018 = vmatprep.subr.bf16.mxu1 %v2343_v13 }
  0xd5   :  { %2094 = vmatprep.mubr.msk.bf16.mxu0 %vm1827_vm9, %v2408_v45 }
  0xd6   :  { %2111 = vmatpush3.bf16.msra.mxu0 %v2342_v26  ;;  %v903_v39 = vpop.permute.xlu0 %902  ;;  %v1549_v26 = vld [vmem:[%s2908_s3 + $0x8] sm:$0xff] }
  0xd7   :  { %v201_v16 = vpop.permute.xlu1 %200  ;;  %2019 = vmatpush3.bf16.msra.mxu1 %v2343_v13  ;;  %2112 = vmatprep.subr.bf16.mxu0 %v2344_v28  ;;  %vm931_vm3 = vcmp.eq.s32.totalorder %v903_v39, %v2625_v42  ;;  %v2174_v13 = vpack.c.bf16 %v1549_v26, %v1548_v25 }
  0xd8   :  { %2306 = vset.pattern.permute.xlu1 %v2407_v37  ;;  %2020 = vmatprep.subr.bf16.mxu1 %v2345_v29  ;;  %vm235_vm10 = vcmp.eq.s32.totalorder %v201_v16, %v2625_v42  ;;  %v1553_v16 = vld [vmem:[%s2908_s3 + $0x28] sm:$0xff] }
  0xd9   :  { %1190 = vperm.xlu1 %2306, %v2521_v15  }
  0xda   :  { %2113 = vmatpush3.bf16.msra.mxu0 %v2344_v28  ;;  %v906_v41 = vpop.permute.xlu0 %905 }
  0xdb   :  { %v204_v32 = vpop.permute.xlu1 %203  ;;  %2021 = vmatpush3.bf16.msra.mxu1 %v2345_v29  ;;  %2114 = vmatprep.subr.bf16.mxu0 %v2346_v30  ;;  %vm932_vm9 = vcmp.eq.s32.totalorder %v906_v41, %v2625_v42  ;;  %v1552_v29 = vld [vmem:[%s2908_s3 + $0x20] sm:$0xff] }
  0xdc   :  { %vm236_vm11 = vcmp.eq.s32.totalorder %v204_v32, %v2625_v42  ;;  %2022 = vmatprep.subr.bf16.mxu1 %v2347_v31  ;;  %v1555_v32 = vld [vmem:[%s2908_s3 + $0x38] sm:$0xff] }
  0xdd   :  { %vm1725_vm12 = vmpackc.low %vm236_vm11, %vm235_vm10  ;;  %2308 = vset.pattern.permute.xlu1 %v2406_v36 }
  0xde   :  { %101 = vperm.xlu1 %2308, %v2533_v19   ;;  %1999 = vmatmul.mubr.msk.bf16.gmra.mrb[4].mxu1 %vm1725_vm12, %v2408_v45  ;;  %vm241_vm12 = vcmp.eq.s32.totalorder %v2676_v8, %v2625_v42 }
  0xdf   :  { %2115 = vmatpush3.bf16.msra.mxu0 %v2346_v30  ;;  %2023 = vmatpush3.bf16.msra.mxu1 %v2347_v31  ;;  %v2180_v30 = vpack.c.bf16 %v1553_v16, %v1552_v29  ;;  %v1554_v31 = vld [vmem:[%s2908_s3 + $0x30] sm:$0xff] }
  0xe0   :  { %v897_v15 = vpop.permute.xlu1 %896  ;;  %2116 = vmatprep.subr.bf16.mxu0 %v2348_v34  ;;  %2024 = vmatprep.subr.bf16.mxu1 %v2349_v35  ;;  %v2183_v33 = vpack.c.bf16 %v1555_v32, %v1554_v31 }
  0xe1   :  { %vm929_vm14 = vcmp.eq.s32.totalorder %v897_v15, %v2625_v42 }
  0xe2   :  { %vm1829_vm15 = vmpackc.low %vm929_vm14, %vm928_vm13  ;;  %2309 = vset.pattern.permute.xlu1 %v2407_v37 }
  0xe3   :  { %1193 = vperm.xlu1 %2309, %v2538_v20   ;;  %2095 = vmatmul.mubr.msk.bf16.gmra.mrb[4].mxu0 %vm1829_vm15, %v2408_v45 }
  0xe4   :  { %2117 = vmatpush3.bf16.msra.mxu0 %v2348_v34  ;;  %2025 = vmatpush3.bf16.msra.mxu1 %v2349_v35  ;;  %v1556_v34 = vld [vmem:[%s2908_s3 + $0x40] sm:$0xff]  ;;  %v1557_v35 = vld [vmem:[%s2908_s3 + $0x48] sm:$0xff] }
  0xe5   :  { %v210_v19 = vpop.permute.xlu1 %209  ;;  %2118 = vmatprep.subr.bf16.mxu0 %v2350_v38  ;;  %2173 = vmatprep.subr.bf16.mxu1 %v2409_v27  ;;  %v2186_v15 = vpack.c.bf16 %v1557_v35, %v1556_v34 }
  0xe6   :  { %vm238_vm1 = vcmp.eq.s32.totalorder %v210_v19, %v2625_v42  ;;  %v1559_v19 = vld [vmem:[%s2908_s3 + $0x58] sm:$0xff] }
  0xe7   :  { %vm1727_vm2 = vmpackc.low %vm238_vm1, %vm237_vm0  ;;  %2310 = vset.pattern.permute.xlu1 %v2406_v36 }
  0xe8   :  { %104 = vperm.xlu1 %2310, %v2550_v24   ;;  %2002 = vmatprep.mubr.msk.bf16.mxu1 %vm1727_vm2, %v2408_v45  ;;  %v915_v24 = vpop.permute.xlu0 %914 }
  0xe9   :  { %2119 = vmatpush3.bf16.msra.mxu0 %v2350_v38  ;;  %vm935_vm15 = vcmp.eq.s32.totalorder %v915_v24, %v2625_v42  ;;  %v1558_v38 = vld [vmem:[%s2908_s3 + $0x50] sm:$0xff]  ;;  %v1563_v24 = vld [vmem:[%s2908_s3 + $0x78] sm:$0xff] }
  0xea   :  { %v900_v20 = vpop.permute.xlu1 %899  ;;  %2120 = vmatprep.subr.bf16.mxu0 %v2351_v40  ;;  %v2189_v39 = vpack.c.bf16 %v1559_v19, %v1558_v38 }
  0xeb   :  { %vm930_vm4 = vcmp.eq.s32.totalorder %v900_v20, %v2625_v42  ;;  %v1561_v20 = vld [vmem:[%s2908_s3 + $0x68] sm:$0xff] }
  0xec   :  { %vm1831_vm5 = vmpackc.low %vm931_vm3, %vm930_vm4  ;;  %107 = vperm.xlu1 %2310, %v2545_v23   ;;  %v918_v46 = vpop.permute.xlu0 %917 }
  0xed   :  { %2098 = vmatprep.mubr.msk.bf16.mxu0 %vm1831_vm5, %v2408_v45  ;;  %2121 = vmatpush3.bf16.msra.mxu0 %v2351_v40  ;;  %vm936_vm5 = vcmp.eq.s32.totalorder %v918_v46, %v2625_v42  ;;  %v1560_v40 = vld [vmem:[%s2908_s3 + $0x60] sm:$0xff] }
  0xee   :  { %v2192_v41 = vpack.c.bf16 %v1561_v20, %v1560_v40 }
  0xef   :  { %v213_v43 = vpop.permute.xlu1 %212 }
  0xf0   :  { %2311 = vset.pattern.permute.xlu1 %v2407_v37  ;;  %vm239_vm6 = vcmp.eq.s32.totalorder %v213_v43, %v2625_v42  ;;  %v63_v37 = vpop.permute.xlu0 %62  ;;  %v1562_v43 = vld [vmem:[%s2908_s3 + $0x70] sm:$0xff] }
  0xf1   :  { %1202 = vperm.xlu1 %2311, %v2545_v23  }
  0xf3   :  { %v216_v36 = vpop.permute.xlu1 %215 }
  0xf4   :  { %vm240_vm7 = vcmp.eq.s32.totalorder %v216_v36, %v2625_v42  ;;  %v75_v48 = vpop.permute.xlu0 %74  ;;  %v2195_v36 = vpack.c.bf16 %v1563_v24, %v1562_v43 }
  0xf5   :  { %vm1729_vm8 = vmpackc.low %vm240_vm7, %vm239_vm6 }
  0xf6   :  { %2003 = vmatmul.mubr.msk.bf16.gmra.mrb[8].mxu1 %vm1729_vm8, %v2408_v45  ;;  %vm109_vm8 = vcmp.eq.s32.totalorder %v63_v37, %v2625_v42 }
  0xf8   :  { %v909_v44 = vpop.permute.xlu1 %908  ;;  %v87_v50 = vpop.permute.xlu0 %86 }
  0xf9   :  { %vm933_vm10 = vcmp.eq.s32.totalorder %v909_v44, %v2625_v42  ;;  %v2411_v44 = vmov 0.0  }
  0xfa   :  { %vm1833_vm11 = vmpackc.low %vm933_vm10, %vm932_vm9 }
  0xfb   :  { %2099 = vmatmul.mubr.msk.bf16.gmra.mrb[8].mxu0 %vm1833_vm11, %v2408_v45 }
  0xfc   :  { %v2742_v53 = vpop.permute.xlu0 %98 }
  0xfd   :  { %v222_v23 = vpop.permute.xlu1 %221 }
  0xfe   :  { %vm242_vm13 = vcmp.eq.s32.totalorder %v222_v23, %v2625_v42 }
  0xff   :  { %vm1731_vm14 = vmpackc.low %vm242_vm13, %vm241_vm12 }
 0x100   :  { %2006 = vmatprep.mubr.msk.bf16.mxu1 %vm1731_vm14, %v2408_v45  ;;  %v1161_v55 = vpop.permute.xlu0 %1160 }
 0x101   :  { %vm1205_vm11 = vcmp.eq.s32.totalorder %v1161_v55, %v2625_v42 }
 0x102   :  { %v912_v47 = vpop.permute.xlu1 %911 }
 0x103   :  { %vm934_vm0 = vcmp.eq.s32.totalorder %v912_v47, %v2625_v42 }
 0x104   :  { %vm1835_vm1 = vmpackc.low %vm935_vm15, %vm934_vm0  ;;  %v1164_v59 = vpop.permute.xlu0 %1163 }
 0x105   :  { %2102 = vmatprep.mubr.msk.bf16.mxu0 %vm1835_vm1, %v2408_v45  ;;  %vm1206_vm1 = vcmp.eq.s32.totalorder %v1164_v59, %v2625_v42 }
 0x107   :  { %v225_v49 = vpop.permute.xlu1 %224 }
 0x108   :  { %vm243_vm2 = vcmp.eq.s32.totalorder %v225_v49, %v2625_v42  ;;  %v1173_v62 = vpop.permute.xlu0 %1172 }
 0x10b   :  { %v228_v51 = vpop.permute.xlu1 %227 }
 0x10c   :  { %vm244_vm3 = vcmp.eq.s32.totalorder %v228_v51, %v2625_v42  ;;  %v1176_v2 = vpop.permute.xlu0 %1175 }
 0x10d   :  { %vm1733_vm4 = vmpackc.low %vm244_vm3, %vm243_vm2 }
 0x10e   :  { %2007 = vmatmul.mubr.msk.bf16.gmra.mrb[12].mxu1 %vm1733_vm4, %v2408_v45  ;;  %vm113_vm4 = vcmp.eq.s32.totalorder %v75_v48, %v2625_v42  ;;  %v2846_v48 = vld [vmem:[%s2907_s2] ss:$0 sm:$0xff] }
 0x110   :  { %v921_v52 = vpop.permute.xlu1 %920  ;;  %v1185_v5 = vpop.permute.xlu0 %1184 }
 0x111   :  { %vm937_vm6 = vcmp.eq.s32.totalorder %v921_v52, %v2625_v42 }
 0x112   :  { %vm1837_vm7 = vmpackc.low %vm937_vm6, %vm936_vm5 }
 0x113   :  { %2103 = vmatmul.mubr.msk.bf16.gmra.mrb[12].mxu0 %vm1837_vm7, %v2408_v45  ;;  %vm1209_vm7 = vcmp.eq.s32.totalorder %v1173_v62, %v2625_v42 }
 0x114   :  { %v1188_v11 = vpop.permute.xlu0 %1187 }
 0x115   :  { %v66_v54 = vpop.permute.xlu1 %65 }
 0x116   :  { %vm110_vm9 = vcmp.eq.s32.totalorder %v66_v54, %v2625_v42 }
 0x117   :  { %vm1743_vm10 = vmpackc.low %vm110_vm9, %vm109_vm8 }
 0x118   :  { %2026 = vmatprep.mubr.msk.bf16.mxu1 %vm1743_vm10, %v2408_v45  ;;  %v1197_v9 = vpop.permute.xlu0 %1196 }
 0x11a   :  { %v1158_v56 = vpop.permute.xlu1 %1157 }
 0x11b   :  { %vm1204_vm12 = vcmp.eq.s32.totalorder %v1158_v56, %v2625_v42 }
 0x11c   :  { %vm1863_vm13 = vmpackc.low %vm1205_vm11, %vm1204_vm12  ;;  %v1200_v21 = vpop.permute.xlu0 %1199 }
 0x11d   :  { %2122 = vmatprep.mubr.msk.bf16.mxu0 %vm1863_vm13, %v2408_v45  ;;  %vm1210_vm13 = vcmp.eq.s32.totalorder %v1176_v2, %v2625_v42 }
 0x11f   :  { %v69_v57 = vpop.permute.xlu1 %68 }
 0x120   :  { %vm111_vm14 = vcmp.eq.s32.totalorder %v69_v57, %v2625_v42 }
 0x123   :  { %v72_v58 = vpop.permute.xlu1 %71 }
 0x124   :  { %vm112_vm15 = vcmp.eq.s32.totalorder %v72_v58, %v2625_v42 }
 0x125   :  { %vm1745_vm0 = vmpackc.low %vm112_vm15, %vm111_vm14 }
 0x126   :  { %2027 = vmatmul.mubr.msk.bf16.vlgmr.msra.gmra.mrb[0].mxu1 %vm1745_vm0, %v2408_v45  ;;  %vm117_vm0 = vcmp.eq.s32.totalorder %v87_v50, %v2625_v42 }
 0x127   :  { %2175 = vmatpush3.bf16.msra.mxu1 %v2174_v13 }
 0x128   :  { %v1167_v60 = vpop.permute.xlu1 %1166  ;;  %2176 = vmatprep.subr.bf16.mxu1 %v2409_v27 }
 0x129   :  { %vm1207_vm2 = vcmp.eq.s32.totalorder %v1167_v60, %v2625_v42 }
 0x12a   :  { %vm1865_vm3 = vmpackc.low %vm1207_vm2, %vm1206_vm1 }
 0x12b   :  { %2123 = vmatmul.mubr.msk.bf16.vlgmr.msra.gmra.mrb[0].mxu0 %vm1865_vm3, %v2408_v45  ;;  %vm1213_vm3 = vcmp.eq.s32.totalorder %v1185_v5, %v2625_v42 }
 0x12d   :  { %v78_v61 = vpop.permute.xlu1 %77 }
 0x12e   :  { %vm114_vm5 = vcmp.eq.s32.totalorder %v78_v61, %v2625_v42  ;;  %v2854_v61 = vld [vmem:[%s2910_s5] sm:$0xff] }
 0x12f   :  { %vm1747_vm6 = vmpackc.low %vm114_vm5, %vm113_vm4 }
 0x130   :  { %2030 = vmatprep.mubr.msk.bf16.mxu1 %vm1747_vm6, %v2408_v45 }
 0x132   :  { %v1170_v63 = vpop.permute.xlu1 %1169 }
 0x133   :  { %vm1208_vm8 = vcmp.eq.s32.totalorder %v1170_v63, %v2625_v42  ;;  %v2859_v63 = vld [vmem:[%s2910_s5 + $0x8] sm:$0xff] }
 0x134   :  { %vm1867_vm9 = vmpackc.low %vm1209_vm7, %vm1208_vm8 }
 0x135   :  { %2126 = vmatprep.mubr.msk.bf16.mxu0 %vm1867_vm9, %v2408_v45  ;;  %vm1214_vm9 = vcmp.eq.s32.totalorder %v1188_v11, %v2625_v42 }
 0x137   :  { %v81_v0 = vpop.permute.xlu1 %80 }
 0x138   :  { %vm115_vm10 = vcmp.eq.s32.totalorder %v81_v0, %v2625_v42 }
 0x13b   :  { %v84_v1 = vpop.permute.xlu1 %83 }
 0x13c   :  { %vm116_vm11 = vcmp.eq.s32.totalorder %v84_v1, %v2625_v42 }
 0x13d   :  { %vm1749_vm12 = vmpackc.low %vm116_vm11, %vm115_vm10 }
 0x13e   :  { %2031 = vmatmul.mubr.msk.bf16.gmra.mrb[4].mxu1 %vm1749_vm12, %v2408_v45  ;;  %vm121_vm12 = vcmp.eq.s32.totalorder %v2742_v53, %v2625_v42 }
 0x140   :  { %v1179_v3 = vpop.permute.xlu1 %1178 }
 0x141   :  { %vm1211_vm14 = vcmp.eq.s32.totalorder %v1179_v3, %v2625_v42 }
 0x142   :  { %vm1869_vm15 = vmpackc.low %vm1211_vm14, %vm1210_vm13 }
 0x143   :  { %2127 = vmatmul.mubr.msk.bf16.gmra.mrb[4].mxu0 %vm1869_vm15, %v2408_v45  ;;  %vm1217_vm15 = vcmp.eq.s32.totalorder %v1197_v9, %v2625_v42 }
 0x145   :  { %v90_v4 = vpop.permute.xlu1 %89 }
 0x146   :  { %vm118_vm1 = vcmp.eq.s32.totalorder %v90_v4, %v2625_v42 }
 0x147   :  { %vm1751_vm2 = vmpackc.low %vm118_vm1, %vm117_vm0 }
 0x148   :  { %2034 = vmatprep.mubr.msk.bf16.mxu1 %vm1751_vm2, %v2408_v45 }
 0x14a   :  { %v1182_v6 = vpop.permute.xlu1 %1181 }
 0x14b   :  { %vm1212_vm4 = vcmp.eq.s32.totalorder %v1182_v6, %v2625_v42 }
 0x14c   :  { %vm1871_vm5 = vmpackc.low %vm1213_vm3, %vm1212_vm4 }
 0x14d   :  { %2130 = vmatprep.mubr.msk.bf16.mxu0 %vm1871_vm5, %v2408_v45  ;;  %vm1218_vm5 = vcmp.eq.s32.totalorder %v1200_v21, %v2625_v42 }
 0x14f   :  { %v93_v7 = vpop.permute.xlu1 %92 }
 0x150   :  { %vm119_vm6 = vcmp.eq.s32.totalorder %v93_v7, %v2625_v42 }
 0x153   :  { %v96_v8 = vpop.permute.xlu1 %95 }
 0x154   :  { %vm120_vm7 = vcmp.eq.s32.totalorder %v96_v8, %v2625_v42 }
 0x155   :  { %vm1753_vm8 = vmpackc.low %vm120_vm7, %vm119_vm6 }
 0x156   :  { %2035 = vmatmul.mubr.msk.bf16.gmra.mrb[8].mxu1 %vm1753_vm8, %v2408_v45  ;;  %vm2410_vm8 = vmmov 0  }
 0x158   :  { %v1191_v10 = vpop.permute.xlu1 %1190 }
 0x159   :  { %vm1215_vm10 = vcmp.eq.s32.totalorder %v1191_v10, %v2625_v42 }
 0x15a   :  { %vm1873_vm11 = vmpackc.low %vm1215_vm10, %vm1214_vm9  ;;  %vm1578_vm9 = vcmask 1041409   ;;  %vm1580_vm10 = vcmask 1042434  }
 0x15b   :  { %2131 = vmatmul.mubr.msk.bf16.gmra.mrb[8].mxu0 %vm1873_vm11, %v2408_v45  ;;  %vm1582_vm11 = vcmask 1043459  }
 0x15d   :  { %v102_v14 = vpop.permute.xlu1 %101 }
 0x15e   :  { %vm122_vm13 = vcmp.eq.s32.totalorder %v102_v14, %v2625_v42 }
 0x15f   :  { %vm1755_vm14 = vmpackc.low %vm122_vm13, %vm121_vm12  ;;  %vm1584_vm12 = vcmask 1044484   ;;  %vm1586_vm13 = vcmask 1045509  }
 0x160   :  { %2038 = vmatprep.mubr.msk.bf16.mxu1 %vm1755_vm14, %v2408_v45  ;;  %vm1588_vm14 = vcmask 1046534  }
 0x162   :  { %v1194_v17 = vpop.permute.xlu1 %1193 }
 0x163   :  { %vm1216_vm0 = vcmp.eq.s32.totalorder %v1194_v17, %v2625_v42 }
 0x164   :  { %vm1875_vm1 = vmpackc.low %vm1217_vm15, %vm1216_vm0  ;;  %vm1590_vm15 = vcmask 1047559  }
 0x165   :  { %2134 = vmatprep.mubr.msk.bf16.mxu0 %vm1875_vm1, %v2408_v45 }
 0x167   :  { %v105_v18 = vpop.permute.xlu1 %104 }
 0x168   :  { %vm123_vm2 = vcmp.eq.s32.totalorder %v105_v18, %v2625_v42 }
 0x16b   :  { %v108_v12 = vpop.permute.xlu1 %107 }
 0x16c   :  { %vm124_vm3 = vcmp.eq.s32.totalorder %v108_v12, %v2625_v42 }
 0x16d   :  { %vm1757_vm4 = vmpackc.low %vm124_vm3, %vm123_vm2 }
 0x16e   :  { %2039 = vmatmul.mubr.msk.bf16.gmra.mrb[12].mxu1 %vm1757_vm4, %v2408_v45 }
 0x16f   :  { %2170 = vmatprep.mubr.msk.f32.mxu1 %vm2410_vm8, %v2411_v44 }
 0x170   :  { %v1203_v22 = vpop.permute.xlu1 %1202 }
 0x171   :  { %vm1219_vm6 = vcmp.eq.s32.totalorder %v1203_v22, %v2625_v42  ;;  %v1550_v42 = vld [vmem:[%s2908_s3 + $0x10] sm:$0xff] }
 0x172   :  { %vm1877_vm7 = vmpackc.low %vm1219_vm6, %vm1218_vm5 }
 0x173   :  { %2135 = vmatmul.mubr.msk.bf16.gmra.mrb[12].mxu0 %vm1877_vm7, %v2408_v45  ;;  %v1551_v45 = vld [vmem:[%s2908_s3 + $0x18] sm:$0xff] }
 0x174   :  { %v2177_v28 = vpack.c.bf16 %v1551_v45, %v1550_v42 }
 0x176   :  { %2178 = vmatpush3.bf16.msra.mxu1 %v2177_v28 }
 0x177   :  { %2179 = vmatprep.subr.bf16.mxu1 %v2409_v27 }
 0x17a   :  { %2181 = vmatpush3.bf16.msra.mxu1 %v2180_v30 }
 0x17b   :  { %2182 = vmatprep.subr.bf16.mxu1 %v2409_v27 }
 0x17e   :  { %2184 = vmatpush3.bf16.msra.mxu1 %v2183_v33 }
 0x17f   :  { %2185 = vmatprep.subr.bf16.mxu1 %v2409_v27 }
 0x182   :  { %2187 = vmatpush3.bf16.msra.mxu1 %v2186_v15 }
 0x183   :  { %2188 = vmatprep.subr.bf16.mxu1 %v2409_v27 }
 0x186   :  { %2190 = vmatpush3.bf16.msra.mxu1 %v2189_v39 }
 0x187   :  { %2191 = vmatprep.subr.bf16.mxu1 %v2409_v27 }
 0x18a   :  { %2193 = vmatpush3.bf16.msra.mxu1 %v2192_v41 }
 0x18b   :  { %2194 = vmatprep.subr.bf16.mxu1 %v2409_v27 }
 0x18e   :  { %2196 = vmatpush3.bf16.msra.mxu1 %v2195_v36 }
 0x1f9   :  { %v2028_v46 = vpop.f32.mrb[0].mxu1 }
 0x1fa   :  { %v529_v23 = vpop.f32.mrb[1].mxu1 }
 0x1fb   :  { %v2029_v37 = vpop.f32.mrb[2].mxu1 }
 0x1fc   :  { %v532_v47 = vpop.f32.mrb[3].mxu1 }
 0x1fe   :  { %v2124_v49 = vpop.f32.mrb[0].mxu0 }
 0x1ff   :  { %v2197_v50 = vadd.f32 %v2124_v49, %v2028_v46  ;;  %v1359_v51 = vpop.f32.mrb[1].mxu0 }
 0x200   :  { %v2198_v52 = vadd.f32 %v1359_v51, %v529_v23  ;;  %v2125_v53 = vpop.f32.mrb[2].mxu0 }
 0x201   :  { %v1446_v54 = vadd.f32 %v2197_v50, %v2846_v48  ;;  %v2199_v55 = vadd.f32 %v2125_v53, %v2029_v37  ;;  %v1362_v56 = vpop.f32.mrb[3].mxu0 }
 0x202   :  { %v1444_v57 = vadd.f32 %v2198_v52, %v2846_v48  ;;  %v2200_v58 = vadd.f32 %v1362_v56, %v532_v47 }
 0x203   :  { %v1462_v59 = vmax.f32 %v1446_v54, 0.0  ;;  %v1447_v60 = vadd.f32 %v2199_v55, %v2846_v48 }
 0x204   :  { %v1460_v62 = vmax.f32 %v1444_v57, 0.0  ;;  %v1445_v0 = vadd.f32 %v2200_v58, %v2846_v48 }
 0x205   :  { %v1463_v1 = vmax.f32 %v1447_v60, 0.0  ;;  %v1478_v3 = vmul.f32 %v1462_v59, %v2854_v61 }
 0x206   :  { %v1461_v2 = vmax.f32 %v1445_v0, 0.0  ;;  %v1476_v5 = vmul.f32 %v1460_v62, %v2854_v61 }
 0x207   :  { %v1479_v4 = vmul.f32 %v1463_v1, %v2859_v63 }
 0x208   :  { %v1477_v6 = vmul.f32 %v1461_v2, %v2859_v63 }
 0x209   :  { %v1499_v7 = vmax.f32 %v1478_v3, %v1479_v4 }
 0x20a   :  { %v1492_v8 = vmax.f32 %v1476_v5, %v1477_v6 }
 0x20b   :  { %v1500_v11 = vrot.slane %v1499_v7, 4 }
 0x20c   :  { %v1493_v10 = vrot.slane %v1492_v8, 4 }
 0x20d   :  { %v1501_v14 = vmax.f32 %v1499_v7, %v1500_v11 }
 0x20e   :  { %v1494_v9 = vmax.f32 %v1492_v8, %v1493_v10 }
 0x20f   :  { %v1502_v17 = vrot.slane %v1501_v14, 2 }
 0x210   :  { %v1495_v18 = vrot.slane %v1494_v9, 2 }
 0x211   :  { %v1503_v12 = vmax.f32 %v1501_v14, %v1502_v17  ;;  %v2032_v21 = vpop.f32.mrb[4].mxu1 }
 0x212   :  { %v1496_v22 = vmax.f32 %v1494_v9, %v1495_v18  ;;  %v545_v25 = vpop.f32.mrb[5].mxu1 }
 0x213   :  { %v1504_v26 = vrot.slane %v1503_v12, 1  ;;  %v2033_v13 = vpop.f32.mrb[6].mxu1 }
 0x214   :  { %v1497_v27 = vrot.slane %v1496_v22, 1  ;;  %v548_v42 = vpop.f32.mrb[7].mxu1 }
 0x215   :  { %v1505_v45 = vmax.f32 %v1503_v12, %v1504_v26 }
 0x216   :  { %v1498_v28 = vmax.f32 %v1496_v22, %v1497_v27  ;;  %v2128_v29 = vpop.f32.mrb[4].mxu0 }
 0x217   :  { %v2201_v16 = vadd.f32 %v2128_v29, %v2032_v21  ;;  %v1375_v30 = vpop.f32.mrb[5].mxu0 }
 0x218   :  { %v1579_v31 = vsel %vm1578_vm9, %v1505_v45, %v1498_v28  ;;  %v2202_v32 = vadd.f32 %v1375_v30, %v545_v25  ;;  %v2129_v33 = vpop.f32.mrb[6].mxu0 }
 0x219   :  { %v1450_v34 = vadd.f32 %v2201_v16, %v2846_v48  ;;  %v2203_v35 = vadd.f32 %v2129_v33, %v2033_v13  ;;  %v1378_v15 = vpop.f32.mrb[7].mxu0 }
 0x21a   :  { %v1448_v38 = vadd.f32 %v2202_v32, %v2846_v48  ;;  %v2204_v19 = vadd.f32 %v1378_v15, %v548_v42 }
 0x21b   :  { %v1466_v39 = vmax.f32 %v1450_v34, 0.0  ;;  %v1451_v40 = vadd.f32 %v2203_v35, %v2846_v48 }
 0x21c   :  { %v1464_v20 = vmax.f32 %v1448_v38, 0.0  ;;  %v1449_v41 = vadd.f32 %v2204_v19, %v2846_v48 }
 0x21d   :  { %v1467_v43 = vmax.f32 %v1451_v40, 0.0  ;;  %v1482_v36 = vmul.f32 %v1466_v39, %v2854_v61 }
 0x21e   :  { %v1465_v24 = vmax.f32 %v1449_v41, 0.0  ;;  %v1480_v46 = vmul.f32 %v1464_v20, %v2854_v61 }
 0x21f   :  { %v1483_v44 = vmul.f32 %v1467_v43, %v2859_v63 }
 0x220   :  { %v1481_v23 = vmul.f32 %v1465_v24, %v2859_v63 }
 0x221   :  { %v1513_v37 = vmax.f32 %v1482_v36, %v1483_v44 }
 0x222   :  { %v1506_v47 = vmax.f32 %v1480_v46, %v1481_v23 }
 0x223   :  { %v1514_v49 = vrot.slane %v1513_v37, 4 }
 0x224   :  { %v1507_v50 = vrot.slane %v1506_v47, 4 }
 0x225   :  { %v1515_v51 = vmax.f32 %v1513_v37, %v1514_v49 }
 0x226   :  { %v1508_v52 = vmax.f32 %v1506_v47, %v1507_v50 }
 0x227   :  { %v1516_v53 = vrot.slane %v1515_v51, 2 }
 0x228   :  { %v1509_v54 = vrot.slane %v1508_v52, 2 }
 0x229   :  { %v1517_v55 = vmax.f32 %v1515_v51, %v1516_v53  ;;  %v2036_v56 = vpop.f32.mrb[8].mxu1 }
 0x22a   :  { %v1510_v57 = vmax.f32 %v1508_v52, %v1509_v54  ;;  %v561_v58 = vpop.f32.mrb[9].mxu1 }
 0x22b   :  { %v1518_v59 = vrot.slane %v1517_v55, 1  ;;  %v2037_v60 = vpop.f32.mrb[10].mxu1 }
 0x22c   :  { %v1511_v62 = vrot.slane %v1510_v57, 1  ;;  %v564_v0 = vpop.f32.mrb[11].mxu1 }
 0x22d   :  { %v1519_v3 = vmax.f32 %v1517_v55, %v1518_v59 }
 0x22e   :  { %v1512_v1 = vmax.f32 %v1510_v57, %v1511_v62  ;;  %v2132_v2 = vpop.f32.mrb[8].mxu0 }
 0x22f   :  { %v2205_v4 = vadd.f32 %v2132_v2, %v2036_v56  ;;  %v1391_v5 = vpop.f32.mrb[9].mxu0 }
 0x230   :  { %v2206_v6 = vadd.f32 %v1391_v5, %v561_v58  ;;  %v2133_v7 = vpop.f32.mrb[10].mxu0  ;;  %v1581_v8 = vsel %vm1580_vm10, %v1512_v1, %v1579_v31 }
 0x231   :  { %v1454_v11 = vadd.f32 %v2205_v4, %v2846_v48  ;;  %v2207_v10 = vadd.f32 %v2133_v7, %v2037_v60  ;;  %v1394_v14 = vpop.f32.mrb[11].mxu0  ;;  %v1583_v9 = vsel %vm1582_vm11, %v1519_v3, %v1581_v8 }
 0x232   :  { %v1452_v17 = vadd.f32 %v2206_v6, %v2846_v48  ;;  %v2208_v18 = vadd.f32 %v1394_v14, %v564_v0 }
 0x233   :  { %v1470_v12 = vmax.f32 %v1454_v11, 0.0  ;;  %v1455_v21 = vadd.f32 %v2207_v10, %v2846_v48 }
 0x234   :  { %v1468_v22 = vmax.f32 %v1452_v17, 0.0  ;;  %v1453_v25 = vadd.f32 %v2208_v18, %v2846_v48 }
 0x235   :  { %v1471_v26 = vmax.f32 %v1455_v21, 0.0  ;;  %v1486_v27 = vmul.f32 %v1470_v12, %v2854_v61 }
 0x236   :  { %v1469_v13 = vmax.f32 %v1453_v25, 0.0  ;;  %v1484_v45 = vmul.f32 %v1468_v22, %v2854_v61 }
 0x237   :  { %v1487_v42 = vmul.f32 %v1471_v26, %v2859_v63 }
 0x238   :  { %v1485_v28 = vmul.f32 %v1469_v13, %v2859_v63 }
 0x239   :  { %v1527_v29 = vmax.f32 %v1486_v27, %v1487_v42 }
 0x23a   :  { %v1520_v16 = vmax.f32 %v1484_v45, %v1485_v28 }
 0x23b   :  { %v1528_v30 = vrot.slane %v1527_v29, 4 }
 0x23c   :  { %v1521_v31 = vrot.slane %v1520_v16, 4 }
 0x23d   :  { %v1529_v32 = vmax.f32 %v1527_v29, %v1528_v30 }
 0x23e   :  { %v1522_v33 = vmax.f32 %v1520_v16, %v1521_v31 }
 0x23f   :  { %v1530_v34 = vrot.slane %v1529_v32, 2 }
 0x240   :  { %v1523_v35 = vrot.slane %v1522_v33, 2 }
 0x241   :  { %v1531_v15 = vmax.f32 %v1529_v32, %v1530_v34  ;;  %v2040_v38 = vpop.f32.mrb[12].mxu1 }
 0x242   :  { %v1524_v19 = vmax.f32 %v1522_v33, %v1523_v35  ;;  %v577_v39 = vpop.f32.mrb[13].mxu1 }
 0x243   :  { %v1532_v40 = vrot.slane %v1531_v15, 1  ;;  %v2041_v20 = vpop.f32.mrb[14].mxu1 }
 0x244   :  { %v1525_v41 = vrot.slane %v1524_v19, 1  ;;  %v580_v43 = vpop.f32.mrb[15].mxu1 }
 0x245   :  { %v1533_v44 = vmax.f32 %v1531_v15, %v1532_v40 }
 0x246   :  { %v1526_v24 = vmax.f32 %v1524_v19, %v1525_v41  ;;  %v2136_v36 = vpop.f32.mrb[12].mxu0 }
 0x247   :  { %v2209_v46 = vadd.f32 %v2136_v36, %v2040_v38  ;;  %v1407_v23 = vpop.f32.mrb[13].mxu0 }
 0x248   :  { %v2210_v37 = vadd.f32 %v1407_v23, %v577_v39  ;;  %v2137_v47 = vpop.f32.mrb[14].mxu0  ;;  %v1585_v49 = vsel %vm1584_vm12, %v1526_v24, %v1583_v9 }
 0x249   :  { %v1458_v50 = vadd.f32 %v2209_v46, %v2846_v48  ;;  %v2211_v51 = vadd.f32 %v2137_v47, %v2041_v20  ;;  %v1410_v52 = vpop.f32.mrb[15].mxu0  ;;  %v1587_v53 = vsel %vm1586_vm13, %v1533_v44, %v1585_v49 }
 0x24a   :  { %v1456_v54 = vadd.f32 %v2210_v37, %v2846_v48  ;;  %v2212_v55 = vadd.f32 %v1410_v52, %v580_v43 }
 0x24b   :  { %v1474_v56 = vmax.f32 %v1458_v50, 0.0  ;;  %v1459_v57 = vadd.f32 %v2211_v51, %v2846_v48 }
 0x24c   :  { %v1472_v58 = vmax.f32 %v1456_v54, 0.0  ;;  %v1457_v59 = vadd.f32 %v2212_v55, %v2846_v48 }
 0x24d   :  { %v1475_v60 = vmax.f32 %v1459_v57, 0.0  ;;  %v1490_v0 = vmul.f32 %v1474_v56, %v2854_v61 }
 0x24e   :  { %v1473_v62 = vmax.f32 %v1457_v59, 0.0  ;;  %v1488_v2 = vmul.f32 %v1472_v58, %v2854_v61 }
 0x24f   :  { %v1491_v1 = vmul.f32 %v1475_v60, %v2859_v63 }
 0x250   :  { %v1489_v3 = vmul.f32 %v1473_v62, %v2859_v63  ;;  %v1880_v63 = vld [vmem:[%s2909_s4] ss:$0 sm:$0xff] }
 0x251   :  { %v1541_v4 = vmax.f32 %v1490_v0, %v1491_v1 }
 0x252   :  { %v1534_v5 = vmax.f32 %v1488_v2, %v1489_v3 }
 0x253   :  { %v1542_v6 = vrot.slane %v1541_v4, 4 }
 0x254   :  { %v1535_v7 = vrot.slane %v1534_v5, 4 }
 0x255   :  { %v1543_v8 = vmax.f32 %v1541_v4, %v1542_v6 }
 0x256   :  { %v1536_v11 = vmax.f32 %v1534_v5, %v1535_v7 }
 0x257   :  { %v1544_v10 = vrot.slane %v1543_v8, 2 }
 0x258   :  { %v1537_v14 = vrot.slane %v1536_v11, 2 }
 0x259   :  { %v1545_v9 = vmax.f32 %v1543_v8, %v1544_v10 }
 0x25a   :  { %v1538_v48 = vmax.f32 %v1536_v11, %v1537_v14 }
 0x25b   :  { %v1546_v17 = vrot.slane %v1545_v9, 1 }
 0x25c   :  { %v1539_v18 = vrot.slane %v1538_v48, 1 }
 0x25d   :  { %v1547_v21 = vmax.f32 %v1545_v9, %v1546_v17 }
 0x25e   :  { %v1540_v12 = vmax.f32 %v1538_v48, %v1539_v18 }
 0x260   :  { %v1589_v22 = vsel %vm1588_vm14, %v1540_v12, %v1587_v53 }
 0x261   :  { %v1591_v61 = vsel %vm1590_vm15, %v1547_v21, %v1589_v22 }
 0x262   :  { %2171 = vmatmul.mubr.f32.vlgmr.msra.gmra.mrb[16].mxu1 %v1591_v61 }
 0x335   :  { %v1659_v25 = vpop.f32.mrb[16].mxu1 }
 0x336   :  { %v1660_v26 = vadd.f32 %v1880_v63, %v1659_v25  ;;  %v2172_v13 = vpop.f32.mrb[17].mxu1 }
 0x338   :  { %1663 = vst [vmem:[#allocation5] sm:$0xff] %v1660_v26 }
 0x339   :  { %2385 = shalt.err (!%p2382_p12)
}
 0x33a   :  { %s2386_s8 = scalar_lea.hbm %s2911_s6, 128 }
 0x33b   :  { %p2387_p13 = scmp.ne.s32.totalorder %s2911_s6, %s2386_s8  ;;  %p2390_p0 = scmp.lt.u32.totalorder %s2386_s8, %s2911_s6 }
 0x33d   :  { %p2392_p1 = pnand %p2390_p0, %p2387_p13 }
 0x33f   :  { %2395 = shalt.err (!%p2392_p1)
}
 0x340   :  { %1673 = dma.vmem_to_hbm [thread:$0]  %s1671_s28, 128, %s2911_s6, [#allocation4]  }
 0x341   :  { %2398 = dma.done.wait [#allocation4], 128  }
 0x342   :  { %2399 = vsyncadd [#allocation4], 4294967168 }
 0x343   :  { %1677 = vsyncpa [#allocation3], 1 }
 0x344   :  { %1678 = vsyncpa [#allocation4], 1 }

</bundles_post_ra>
